<compile_context>
chip_gen: v7x
topology: tpu7x:2x2x1
jax: 0.10.0
libtpu: 0.0.40
codegen_flags: <defaults>
</compile_context>

<pallas_src>
import functools

import jax
import jax.numpy as jnp
from jax.experimental import pallas as pl
from jax.experimental.pallas import tpu as pltpu


def gat_proj_kernel(nfeat_ref, wt_ref, al_ref, ar_ref,
                    feat_ref, el_t_ref, er_ref):
    # feat = fc(nfeat) -> (N, H*Dout), single MXU matmul, computed exactly once.
    feat = jnp.dot(nfeat_ref[...], wt_ref[...],
                   preferred_element_type=jnp.float32)
    feat_ref[...] = feat

    # Per-node attention scores for all heads via block-diagonal projections:
    #   el[n, h] = sum_d feat[n, h*Dout + d] * attn_l[h, d]   (source score)
    #   er[n, h] = sum_d feat[n, h*Dout + d] * attn_r[h, d]   (dest score)
    # One small MXU matmul each instead of 2*H per-head cross-lane reductions.
    el = jnp.dot(feat, al_ref[...], preferred_element_type=jnp.float32)   # (N, H)
    er = jnp.dot(feat, ar_ref[...], preferred_element_type=jnp.float32)   # (N, H)
    er_ref[...] = er
    # One transpose so each head's source scores are a lane-major (1, N) row.
    el_t_ref[...] = el.T                                                  # (H, N)


def gat_attn_kernel(feat_ref, el_t_ref, er_ref, adj_ref, out_ref,
                    *, num_heads, out_dim):
    tile = out_ref.shape[0]
    row0 = pl.multiple_of(pl.program_id(0) * tile, tile)

    # adj tile for this block of destination rows; stored bf16 in HBM,
    # promoted to f32 once here (exact for a 0/1 adjacency).
    adj = adj_ref[...].astype(jnp.float32)                    # (T, N_src)
    feat_all = feat_ref[...]                                  # (N_src, H*Dout)
    feat_dst = feat_ref[pl.ds(row0, tile), :]                 # (T, H*Dout)
    er_dst = er_ref[pl.ds(row0, tile), :]                     # (T, H)
    el_t = el_t_ref[...]                                      # (H, N_src)

    # degs = in_degree + 1 ; sfeat = fc(nfeat) / degs   (skip term of the layer)
    degs = jnp.sum(adj, axis=1, keepdims=True) + 1.0          # (T, 1)
    sfeat = feat_dst * pl.reciprocal(degs)                    # (T, H*Dout)

    # Head-invariant additive mask (hoisted out of the head loop):
    # 0 on edges, -1e30 on non-edges.
    neg_bias = jnp.where(adj > 0, 0.0, -1e30)                 # (T, N_src)

    for h in range(num_heads):                                # H static -> unrolled
        lo = h * out_dim
        hi = lo + out_dim
        fh = feat_all[:, lo:hi]                               # (N_src, Dout)

        # e[dst, src] = LeakyReLU_{0.2}( el[src] + er[dst] )
        e = er_dst[:, h:h + 1] + el_t[h:h + 1, :]             # (T, N_src)
        e = jnp.maximum(e, 0.2 * e)                           # LeakyReLU (mul+max)

        # edge_softmax over incoming edges of each destination row.
        logits = e + neg_bias
        m = jnp.max(logits, axis=1, keepdims=True)            # (T, 1)
        p = jnp.exp(logits - m) * adj                         # mask -> zero-in-degree rows stay 0
        denom = jnp.sum(p, axis=1, keepdims=True)             # (T, 1)
        # Fold the softmax normalization into a post-matmul (T,1) scale
        # instead of dividing the whole (T,N) alpha.  (pl.reciprocal(...,
        # approx=True) would move this onto the EUP; exact form kept on the
        # tiny (T,1) vector for bit-accuracy headroom.)
        inv_denom = pl.reciprocal(jnp.maximum(denom, 1e-30))  # (T, 1)

        # aggregation: rst[dst] = (sum_src p[dst,src] * feat[src]) / denom[dst]
        rst_h = jnp.dot(p, fh, preferred_element_type=jnp.float32) * inv_denom

        # Write directly into the output VMEM block with the sfeat term folded
        # in; the HBM writeback is one full-width (T, H*Dout) DMA per tile.
        out_ref[:, lo:hi] = rst_h + sfeat[:, lo:hi]


def _pick_tile_dst(n, target=512):
    """Largest tile >= 16 that divides n (halving from target), else n."""
    if n <= target:
        return n
    t = target
    while t >= 16 and n % t != 0:
        t //= 2
    return t if (t >= 16 and n % t == 0) else n


def gat_conv_layer(nfeat, wt, attn_l, attn_r, adj, *, tile_dst=None,
                   vmem_limit_bytes=64 * 1024 * 1024):
    """GATConvLayer forward (econv=False).

    nfeat : (N, Din) f32 node features
    wt    : (Din, H*Dout) f32   -- gatconv.fc weight, transposed
    attn_l, attn_r : (H, Dout) f32
    adj   : (N, N) 0/1, adj[dst, src] = 1 iff edge src -> dst
    """
    N, Din = nfeat.shape
    H, Dout = attn_l.shape
    HD = H * Dout

    # Block-diagonal projection matrices so el/er for all heads are one matmul.
    eye = jnp.eye(H, dtype=jnp.float32)
    al_bd = (attn_l[:, :, None] * eye[:, None, :]).reshape(HD, H)
    ar_bd = (attn_r[:, :, None] * eye[:, None, :]).reshape(HD, H)

    # ---- kernel 1: shared projection (feat / el_t / er computed once) ----
    feat, el_t, er = pl.pallas_call(
        gat_proj_kernel,
        out_shape=(
            jax.ShapeDtypeStruct((N, HD), jnp.float32),
            jax.ShapeDtypeStruct((H, N), jnp.float32),
            jax.ShapeDtypeStruct((N, H), jnp.float32),
        ),
        grid=(1,),
        in_specs=[
            pl.BlockSpec((N, Din), lambda i: (0, 0)),
            pl.BlockSpec((Din, HD), lambda i: (0, 0)),
            pl.BlockSpec((HD, H), lambda i: (0, 0)),
            pl.BlockSpec((HD, H), lambda i: (0, 0)),
        ],
        out_specs=(
            pl.BlockSpec((N, HD), lambda i: (0, 0)),
            pl.BlockSpec((H, N), lambda i: (0, 0)),
            pl.BlockSpec((N, H), lambda i: (0, 0)),
        ),
        compiler_params=pltpu.CompilerParams(
            vmem_limit_bytes=vmem_limit_bytes),
    )(nfeat.astype(jnp.float32), wt.astype(jnp.float32), al_bd, ar_bd)

    # ---- kernel 2: per-dst-tile masked softmax + aggregation ----
    if tile_dst is None:
        tile_dst = _pick_tile_dst(N)
    assert N % tile_dst == 0, (N, tile_dst)

    # adj is the only large HBM operand: carry it as bf16 (0/1 is exact).
    adj_bf16 = adj.astype(jnp.bfloat16)

    kernel = functools.partial(gat_attn_kernel, num_heads=H, out_dim=Dout)
    out = pl.pallas_call(
        kernel,
        out_shape=jax.ShapeDtypeStruct((N, HD), jnp.float32),
        grid=(N // tile_dst,),
        in_specs=[
            pl.BlockSpec((N, HD), lambda i: (0, 0)),         # feat: resident across tiles
            pl.BlockSpec((H, N), lambda i: (0, 0)),          # el_t: resident
            pl.BlockSpec((N, H), lambda i: (0, 0)),          # er:   resident
            pl.BlockSpec((tile_dst, N), lambda i: (i, 0)),   # adj:  streamed per dst tile
        ],
        out_specs=pl.BlockSpec((tile_dst, HD), lambda i: (i, 0)),
        compiler_params=pltpu.CompilerParams(
            dimension_semantics=("parallel",),   # dst tiles independent -> megacore on v7x
            vmem_limit_bytes=vmem_limit_bytes),
    )(feat, el_t, er, adj_bf16)
    return out


def gat_reference(nfeat, wt, attn_l, attn_r, adj):
    """Pure-JAX reference mirroring DGL GATConv + the module's sfeat term."""
    N = nfeat.shape[0]
    H, Dout = attn_l.shape
    feat = nfeat @ wt                                       # (N, H*Dout)
    degs = adj.sum(1, keepdims=True) + 1.0
    sfeat = feat / degs
    f3 = feat.reshape(N, H, Dout)
    el = (f3 * attn_l[None]).sum(-1)                        # (N, H)
    er = (f3 * attn_r[None]).sum(-1)                        # (N, H)
    e = er[:, None, :] + el[None, :, :]                     # (dst, src, H)
    e = jnp.where(e > 0, e, 0.2 * e)
    logits = jnp.where(adj[:, :, None] > 0, e, -1e30)
    m = logits.max(1, keepdims=True)
    p = jnp.exp(logits - m) * adj[:, :, None]
    alpha = p / jnp.maximum(p.sum(1, keepdims=True), 1e-30)
    rst = jnp.einsum('dsh,shf->dhf', alpha, f3).reshape(N, H * Dout)
    return rst + sfeat


if __name__ == "__main__":
    # Small synthetic problem: 64 nodes, input_dim=32, output_dim=16, 8 heads.
    N, Din, Dout, H = 64, 32, 16, 8

    key = jax.random.PRNGKey(0)
    k_feat, k_w, k_al, k_ar, k_adj = jax.random.split(key, 5)

    nfeat = jax.random.normal(k_feat, (N, Din), dtype=jnp.float32)

    # gatconv.fc : Linear(Din, H*Dout, bias=False) -> weight (H*Dout, Din)
    w_fc = 0.1 * jax.random.normal(k_w, (H * Dout, Din), dtype=jnp.float32)
    wt = w_fc.T                                             # (Din, H*Dout)

    # attn_l / attn_r : DGL shape (1, H, Dout) -> stored as (H, Dout)
    attn_l = 0.1 * jax.random.normal(k_al, (H, Dout), dtype=jnp.float32)
    attn_r = 0.1 * jax.random.normal(k_ar, (H, Dout), dtype=jnp.float32)

    # Random directed graph with self-loops; adj[dst, src] = 1.0 iff edge src->dst.
    adj = (jax.random.uniform(k_adj, (N, N)) < 0.15).astype(jnp.float32)
    adj = jnp.maximum(adj, jnp.eye(N, dtype=jnp.float32))

    # tile_dst=32 -> grid=(2,) so the dst tiling / parallel axis is exercised.
    out = gat_conv_layer(nfeat, wt, attn_l, attn_r, adj, tile_dst=32)
    out = jax.block_until_ready(out)

    ref = gat_reference(nfeat, wt, attn_l, attn_r, adj)
    if not jnp.allclose(out, ref, atol=1e-4, rtol=1e-4):
        max_err = float(jnp.max(jnp.abs(out - ref)))
        raise AssertionError(f"Pallas kernel mismatch vs reference, max |err| = {max_err}")

    print("KERNEL_OK")
</pallas_src>

<mosaic_0001>
module attributes {stable_mosaic.version = 11 : i64} {
  func.func @gat_proj_kernel(%arg0: i32, %arg1: memref<64x32xf32, #tpu.memory_space<vmem>>, %arg2: memref<32x128xf32, #tpu.memory_space<vmem>>, %arg3: memref<128x8xf32, #tpu.memory_space<vmem>>, %arg4: memref<128x8xf32, #tpu.memory_space<vmem>>, %arg5: memref<64x128xf32, #tpu.memory_space<vmem>>, %arg6: memref<8x64xf32, #tpu.memory_space<vmem>>, %arg7: memref<64x8xf32, #tpu.memory_space<vmem>>) attributes {dimension_semantics = [#tpu.dimension_semantics<arbitrary>], iteration_bounds = array<i64: 1>, scalar_prefetch = 0 : i64, scratch_operands = 0 : i64, tpu.core_type = #tpu.core_type<tc>, window_params = [{pipeline_mode = #tpu.pipeline_mode<synchronous>, transform_indices = @transform_0, window_bounds = array<i64: 64, 32>}, {pipeline_mode = #tpu.pipeline_mode<synchronous>, transform_indices = @transform_1, window_bounds = array<i64: 32, 128>}, {pipeline_mode = #tpu.pipeline_mode<synchronous>, transform_indices = @transform_2, window_bounds = array<i64: 128, 8>}, {pipeline_mode = #tpu.pipeline_mode<synchronous>, transform_indices = @transform_3, window_bounds = array<i64: 128, 8>}, {pipeline_mode = #tpu.pipeline_mode<synchronous>, transform_indices = @transform_4, window_bounds = array<i64: 64, 128>}, {pipeline_mode = #tpu.pipeline_mode<synchronous>, transform_indices = @transform_5, window_bounds = array<i64: 8, 64>}, {pipeline_mode = #tpu.pipeline_mode<synchronous>, transform_indices = @transform_6, window_bounds = array<i64: 64, 8>}]} {
    %c0 = arith.constant 0 : index
    %c0_0 = arith.constant 0 : index
    %0 = vector.load %arg1[%c0, %c0_0] : memref<64x32xf32, #tpu.memory_space<vmem>>, vector<64x32xf32>
    %c0_1 = arith.constant 0 : index
    %c0_2 = arith.constant 0 : index
    %1 = vector.load %arg2[%c0_1, %c0_2] : memref<32x128xf32, #tpu.memory_space<vmem>>, vector<32x128xf32>
    %cst = arith.constant dense<0.000000e+00> : vector<64x128xf32>
    %2 = tpu.matmul %0, %1, %cst {dimension_numbers = #tpu.dot_dimension_numbers<[1], [0], [0], [1], [0, 0, 1, 1], [], []>} : vector<64x32xf32>, vector<32x128xf32>, vector<64x128xf32> -> vector<64x128xf32>
    %c0_3 = arith.constant 0 : index
    %c0_4 = arith.constant 0 : index
    %3 = vector.load %arg5[%c0_3, %c0_4] : memref<64x128xf32, #tpu.memory_space<vmem>>, vector<64x128xf32>
    tpu.vector_store %arg5[%c0_3, %c0_4], %2 {strides = array<i32>} : memref<64x128xf32, #tpu.memory_space<vmem>>, vector<64x128xf32>,
    %c0_5 = arith.constant 0 : index
    %c0_6 = arith.constant 0 : index
    %4 = vector.load %arg3[%c0_5, %c0_6] : memref<128x8xf32, #tpu.memory_space<vmem>>, vector<128x8xf32>
    %cst_7 = arith.constant dense<0.000000e+00> : vector<64x8xf32>
    %5 = tpu.matmul %2, %4, %cst_7 {dimension_numbers = #tpu.dot_dimension_numbers<[1], [0], [0], [1], [0, 0, 1, 1], [], []>} : vector<64x128xf32>, vector<128x8xf32>, vector<64x8xf32> -> vector<64x8xf32>
    %c0_8 = arith.constant 0 : index
    %c0_9 = arith.constant 0 : index
    %6 = vector.load %arg4[%c0_8, %c0_9] : memref<128x8xf32, #tpu.memory_space<vmem>>, vector<128x8xf32>
    %cst_10 = arith.constant dense<0.000000e+00> : vector<64x8xf32>
    %7 = tpu.matmul %2, %6, %cst_10 {dimension_numbers = #tpu.dot_dimension_numbers<[1], [0], [0], [1], [0, 0, 1, 1], [], []>} : vector<64x128xf32>, vector<128x8xf32>, vector<64x8xf32> -> vector<64x8xf32>
    %c0_11 = arith.constant 0 : index
    %c0_12 = arith.constant 0 : index
    %8 = vector.load %arg7[%c0_11, %c0_12] : memref<64x8xf32, #tpu.memory_space<vmem>>, vector<64x8xf32>
    tpu.vector_store %arg7[%c0_11, %c0_12], %7 {strides = array<i32>} : memref<64x8xf32, #tpu.memory_space<vmem>>, vector<64x8xf32>,
    %9 = tpu.transpose %5, [1, 0] : vector<64x8xf32> -> vector<8x64xf32>
    %c0_13 = arith.constant 0 : index
    %c0_14 = arith.constant 0 : index
    %10 = vector.load %arg6[%c0_13, %c0_14] : memref<8x64xf32, #tpu.memory_space<vmem>>, vector<8x64xf32>
    tpu.vector_store %arg6[%c0_13, %c0_14], %9 {strides = array<i32>} : memref<8x64xf32, #tpu.memory_space<vmem>>, vector<8x64xf32>,
    return
  }
  func.func @transform_0(%arg0: i32) -> (i32, i32) {
    %c0_i32 = arith.constant 0 : i32
    %c0_i32_0 = arith.constant 0 : i32
    %c0_i32_1 = arith.constant 0 : i32
    return %c0_i32, %c0_i32_0 : i32, i32
  }
  func.func @transform_1(%arg0: i32) -> (i32, i32) {
    %c0_i32 = arith.constant 0 : i32
    %c0_i32_0 = arith.constant 0 : i32
    %c0_i32_1 = arith.constant 0 : i32
    return %c0_i32, %c0_i32_0 : i32, i32
  }
  func.func @transform_2(%arg0: i32) -> (i32, i32) {
    %c0_i32 = arith.constant 0 : i32
    %c0_i32_0 = arith.constant 0 : i32
    %c0_i32_1 = arith.constant 0 : i32
    return %c0_i32, %c0_i32_0 : i32, i32
  }
  func.func @transform_3(%arg0: i32) -> (i32, i32) {
    %c0_i32 = arith.constant 0 : i32
    %c0_i32_0 = arith.constant 0 : i32
    %c0_i32_1 = arith.constant 0 : i32
    return %c0_i32, %c0_i32_0 : i32, i32
  }
  func.func @transform_4(%arg0: i32) -> (i32, i32) {
    %c0_i32 = arith.constant 0 : i32
    %c0_i32_0 = arith.constant 0 : i32
    %c0_i32_1 = arith.constant 0 : i32
    return %c0_i32, %c0_i32_0 : i32, i32
  }
  func.func @transform_5(%arg0: i32) -> (i32, i32) {
    %c0_i32 = arith.constant 0 : i32
    %c0_i32_0 = arith.constant 0 : i32
    %c0_i32_1 = arith.constant 0 : i32
    return %c0_i32, %c0_i32_0 : i32, i32
  }
  func.func @transform_6(%arg0: i32) -> (i32, i32) {
    %c0_i32 = arith.constant 0 : i32
    %c0_i32_0 = arith.constant 0 : i32
    %c0_i32_1 = arith.constant 0 : i32
    return %c0_i32, %c0_i32_0 : i32, i32
  }
}

</mosaic_0001>

<bundles_post_ra>
// kernel: tpu_custom_call.1
= control target key start
LH: loop header
LB: loop body
LE: loop exit
PB: predicated region body
PF: predicated region fallthrough
CT: control target
= control target key end

     0   :  { %12 = vsyncpa [#allocation3], 0  ;;  %s1165_s0 = inlined_call_operand.hbm [shape: f32[64,32], index: 0, kind: input, shape index: {}]   ;;  %s1166_s1 = inlined_call_operand.hbm [shape: f32[32,128], index: 1, kind: input, shape index: {}]   ;;  %s1167_s2 = inlined_call_operand.hbm [shape: f32[128,8], index: 2, kind: input, shape index: {}]   ;;  %s1168_s3 = inlined_call_operand.hbm [shape: f32[128,8], index: 3, kind: input, shape index: {}]   ;;  %s1169_s4 = inlined_call_operand.hbm [shape: f32[64,128], index: 4, kind: output, shape index: {0}]   ;;  %s1170_s5 = inlined_call_operand.hbm [shape: f32[8,64], index: 5, kind: output, shape index: {1}]   ;;  %s1171_s6 = inlined_call_operand.hbm [shape: f32[64,8], index: 6, kind: output, shape index: {2}]  }
   0x1   :  { %13 = vsyncpa [#allocation6], 0 }
   0x2   :  { %14 = vsyncpa [#allocation9], 0 }
   0x3   :  { %15 = vsyncpa [#allocation4], 0 }
   0x4   :  { %16 = vsyncpa [#allocation12], 0  ;;  %s982_s21 = smov [#allocation5]   ;;  %s983_s23 = smov [#allocation2]  }
   0x5   :  { %s34_s22 = sshll.u32 %s982_s21, 4  ;;  %s22_s24 = sshll.u32 %s983_s23, 4  ;;  %s35_s22 = int_to_ptr.vmem [resolvable:$true] %s34_s22  ;;  %s1026_s24 = int_to_ptr.vmem [resolvable:$true] %s22_s24 }
   0x6   :  { %s818_s27 = scalar_lea.hbm %s1166_s1, 512 }
   0x7   :  { %p819_p0 = scmp.ne.s32.totalorder %s1166_s1, %s818_s27  ;;  %p822_p1 = scmp.lt.u32.totalorder %s818_s27, %s1166_s1 }
   0x9   :  { %p824_p2 = pnand %p822_p1, %p819_p0 }
   0xb   :  { %827 = shalt.err (!%p824_p2)
}
   0xc   :  { %s828_s8 = scalar_lea.vmem %s35_s22, 512  ;;  %p833_p4 = scmp.lt.s32.totalorder %s35_s22, %s35_s22 }
   0xd   :  { %p829_p3 = scmp.ne.s32.totalorder %s35_s22, %s828_s8  ;;  %p834_p5 = scmp.lt.s32.totalorder %s828_s8, %s828_s8 }
   0xf   :  { %p835_p6 = por %p834_p5, %p833_p4 }
  0x11   :  { %p836_p7 = pnand %p835_p6, %p829_p3 }
  0x13   :  { %839 = shalt.err (!%p836_p7)
}
  0x14   :  { %s984_s9 = smov 128   ;;  %s985_s10 = smov 8  }
  0x15   :  { %40 = dma.hbm_to_vmem [thread:$0]  %s1166_s1, 512, %s35_s22, [#allocation6], %s984_s9, %s984_s9, %s985_s10  }
  0x16   :  { %s840_s15 = scalar_lea.hbm %s1165_s0, 1024 }
  0x17   :  { %p841_p8 = scmp.ne.s32.totalorder %s1165_s0, %s840_s15  ;;  %p844_p9 = scmp.lt.u32.totalorder %s840_s15, %s1165_s0 }
  0x19   :  { %p846_p10 = pnand %p844_p9, %p841_p8 }
  0x1b   :  { %849 = shalt.err (!%p846_p10)
}
  0x1c   :  { %s850_s20 = scalar_lea.vmem %s1026_s24, 1024  ;;  %p855_p12 = scmp.lt.s32.totalorder %s1026_s24, %s1026_s24 }
  0x1d   :  { %p851_p11 = scmp.ne.s32.totalorder %s1026_s24, %s850_s20  ;;  %p856_p13 = scmp.lt.s32.totalorder %s850_s20, %s850_s20 }
  0x1f   :  { %p857_p0 = por %p856_p13, %p855_p12 }
  0x21   :  { %p858_p1 = pnand %p857_p0, %p851_p11 }
  0x23   :  { %861 = shalt.err (!%p858_p1)
}
  0x24   :  { %28 = dma.hbm_to_vmem [thread:$0]  %s1165_s0, 1024, %s1026_s24, [#allocation3], %s984_s9, %s984_s9, %s985_s10  }
  0x25   :  { %s986_s22 = smov [#allocation7]   ;;  %s987_s25 = smov [#allocation8]  }
  0x26   :  { %s46_s23 = sshll.u32 %s986_s22, 4  ;;  %s58_s26 = sshll.u32 %s987_s25, 4  ;;  %s47_s23 = int_to_ptr.vmem [resolvable:$true] %s46_s23  ;;  %s1063_s26 = int_to_ptr.vmem [resolvable:$true] %s58_s26 }
  0x27   :  { %s862_s29 = scalar_lea.hbm %s1167_s2, 2048 }
  0x28   :  { %p863_p2 = scmp.ne.s32.totalorder %s1167_s2, %s862_s29  ;;  %p866_p3 = scmp.lt.u32.totalorder %s862_s29, %s1167_s2 }
  0x2a   :  { %p868_p4 = pnand %p866_p3, %p863_p2 }
  0x2c   :  { %871 = shalt.err (!%p868_p4)
}
  0x2d   :  { %s872_s0 = scalar_lea.vmem %s47_s23, 2048  ;;  %p877_p6 = scmp.lt.s32.totalorder %s47_s23, %s47_s23 }
  0x2e   :  { %p873_p5 = scmp.ne.s32.totalorder %s47_s23, %s872_s0  ;;  %p878_p7 = scmp.lt.s32.totalorder %s872_s0, %s872_s0 }
  0x30   :  { %p879_p8 = por %p878_p7, %p877_p6 }
  0x32   :  { %p880_p9 = pnand %p879_p8, %p873_p5 }
  0x34   :  { %883 = shalt.err (!%p880_p9)
}
  0x35   :  { %52 = dma.hbm_to_vmem [thread:$0]  %s1167_s2, 2048, %s47_s23, [#allocation6], %s984_s9, %s984_s9, %s985_s10  }
  0x36   :  { %s884_s15 = scalar_lea.hbm %s1168_s3, 2048 }
  0x37   :  { %p885_p10 = scmp.ne.s32.totalorder %s1168_s3, %s884_s15  ;;  %p888_p11 = scmp.lt.u32.totalorder %s884_s15, %s1168_s3 }
  0x39   :  { %p890_p12 = pnand %p888_p11, %p885_p10 }
  0x3b   :  { %893 = shalt.err (!%p890_p12)
}
  0x3c   :  { %s894_s20 = scalar_lea.vmem %s1063_s26, 2048  ;;  %p899_p0 = scmp.lt.s32.totalorder %s1063_s26, %s1063_s26 }
  0x3d   :  { %p895_p13 = scmp.ne.s32.totalorder %s1063_s26, %s894_s20  ;;  %p900_p1 = scmp.lt.s32.totalorder %s894_s20, %s894_s20 }
  0x3f   :  { %p901_p2 = por %p900_p1, %p899_p0 }
  0x41   :  { %p902_p3 = pnand %p901_p2, %p895_p13 }
  0x43   :  { %905 = shalt.err (!%p902_p3)
}
  0x44   :  { %64 = dma.hbm_to_vmem [thread:$0]  %s1168_s3, 2048, %s1063_s26, [#allocation9], %s984_s9, %s984_s9, %s985_s10  }
  0x45   :  { %972 = dma.done.wait [#allocation3], 1024  }
  0x46   :  { %973 = vsyncadd [#allocation3], 4294966272 }
  0x47   :  { %974 = dma.done.wait [#allocation6], 2560  }
  0x48   :  { %975 = vsyncadd [#allocation6], 4294964736 }
  0x49   :  { %976 = dma.done.wait [#allocation9], 2048  }
  0x4a   :  { %977 = vsyncadd [#allocation9], 4294965248  ;;  %vm89_vm0 = vcmask 261120   ;;  %v85_v0 = vld [vmem:[#allocation5] sm:$0xff]  ;;  %v86_v1 = vld [vmem:[#allocation5 + $0x8] sm:$0xff]  ;;  %vm469_vm1 = vcmask 64512  }
  0x4b   :  { %v87_v2 = vld [vmem:[#allocation5 + $0x10] sm:$0xff]  ;;  %v736_v3 = vpack.c.bf16 %v86_v1, %v85_v0  ;;  %v88_v4 = vld [vmem:[#allocation5 + $0x18] sm:$0xff]  ;;  %v77_v5 = vld [vmem:[#allocation2] sm:$0xff]  ;;  %s988_s3 = smov [#allocation10]  }
  0x4c   :  { %v740_v6 = vpack.c.bf16 %v88_v4, %v87_v2  ;;  %636 = vmatprep.mubr.msk.f32.mxu0 %vm89_vm0, %v77_v5  ;;  %v227_v7 = vld [vmem:[#allocation7] sm:$0xff]  ;;  %v228_v8 = vld [vmem:[#allocation7 + $0x8] sm:$0xff]  ;;  %v229_v12 = vld [vmem:[#allocation7 + $0x10] sm:$0xff]  ;;  %s517_s21 = sshll.u32 %s988_s3, 4  ;;  %s518_s21 = int_to_ptr.vmem [resolvable:$true] %s517_s21 }
  0x4d   :  { %737 = vmatprep.subr.bf16.mxu0 %v736_v3  ;;  %v348_v9 = vld [vmem:[#allocation8] sm:$0xff]  ;;  %v744_v10 = vpack.c.bf16 %v228_v8, %v227_v7  ;;  %v349_v11 = vld [vmem:[#allocation8 + $0x8] sm:$0xff]  ;;  %v230_v13 = vld [vmem:[#allocation7 + $0x18] sm:$0xff]  ;;  %s906_s22 = scalar_lea.vmem %s518_s21, 1024  ;;  %p911_p5 = scmp.lt.s32.totalorder %s518_s21, %s518_s21 }
  0x4e   :  { %739 = vmatpush3.bf16.msra.mxu0 %v736_v3  ;;  %v776_v14 = vpack.c.bf16 %v349_v11, %v348_v9  ;;  %v748_v15 = vpack.c.bf16 %v230_v13, %v229_v12  ;;  %v350_v16 = vld [vmem:[#allocation8 + $0x10] sm:$0xff]  ;;  %v351_v17 = vld [vmem:[#allocation8 + $0x18] sm:$0xff]  ;;  %v231_v18 = vld [vmem:[#allocation7 + $0x20] sm:$0xff]  ;;  %p907_p4 = scmp.ne.s32.totalorder %s518_s21, %s906_s22  ;;  %p912_p6 = scmp.lt.s32.totalorder %s906_s22, %s906_s22 }
  0x4f   :  { %741 = vmatprep.subr.bf16.mxu0 %v740_v6  ;;  %745 = vmatprep.subr.bf16.mxu1 %v744_v10  ;;  %v232_v19 = vld [vmem:[#allocation7 + $0x28] sm:$0xff]  ;;  %v79_v21 = vld [vmem:[#allocation2 + $0x10] sm:$0xff]  ;;  %v780_v22 = vpack.c.bf16 %v351_v17, %v350_v16  ;;  %v352_v24 = vld [vmem:[#allocation8 + $0x20] sm:$0xff] }
  0x50   :  { %v78_v20 = vld [vmem:[#allocation2 + $0x8] sm:$0xff]  ;;  %747 = vmatpush3.bf16.msra.mxu1 %v744_v10  ;;  %v752_v23 = vpack.c.bf16 %v232_v19, %v231_v18  ;;  %v233_v26 = vld [vmem:[#allocation7 + $0x30] sm:$0xff]  ;;  %v234_v27 = vld [vmem:[#allocation7 + $0x38] sm:$0xff]  ;;  %p913_p7 = por %p912_p6, %p911_p5 }
  0x51   :  { %749 = vmatprep.subr.bf16.mxu1 %v748_v15  ;;  %v353_v25 = vld [vmem:[#allocation8 + $0x28] sm:$0xff]  ;;  %v80_v28 = vld [vmem:[#allocation2 + $0x18] sm:$0xff]  ;;  %v81_v29 = vld [vmem:[#allocation2 + $0x20] sm:$0xff]  ;;  %v756_v31 = vpack.c.bf16 %v234_v27, %v233_v26 }
  0x52   :  { %743 = vmatpush3.bf16.msra.mxu0 %v740_v6  ;;  %v784_v30 = vpack.c.bf16 %v353_v25, %v352_v24  ;;  %v354_v32 = vld [vmem:[#allocation8 + $0x30] sm:$0xff]  ;;  %v355_v33 = vld [vmem:[#allocation8 + $0x38] sm:$0xff]  ;;  %v235_v34 = vld [vmem:[#allocation7 + $0x40] sm:$0xff]  ;;  %p914_p8 = pnand %p913_p7, %p907_p4 }
  0x53   :  { %777 = vmatprep.subr.bf16.mxu0 %v776_v14  ;;  %v236_v35 = vld [vmem:[#allocation7 + $0x48] sm:$0xff]  ;;  %v83_v37 = vld [vmem:[#allocation2 + $0x30] sm:$0xff]  ;;  %v788_v38 = vpack.c.bf16 %v355_v33, %v354_v32  ;;  %v356_v40 = vld [vmem:[#allocation8 + $0x40] sm:$0xff] }
  0x54   :  { %751 = vmatpush3.bf16.msra.mxu1 %v748_v15  ;;  %v82_v36 = vld [vmem:[#allocation2 + $0x28] sm:$0xff]  ;;  %v760_v39 = vpack.c.bf16 %v236_v35, %v235_v34  ;;  %v237_v42 = vld [vmem:[#allocation7 + $0x50] sm:$0xff]  ;;  %v238_v43 = vld [vmem:[#allocation7 + $0x58] sm:$0xff] }
  0x55   :  { %637 = vmatmul.mubr.msk.f32.vlgmr.msra.gmra.mrb[0].mxu0 %vm89_vm0, %v78_v20  ;;  %753 = vmatprep.subr.bf16.mxu1 %v752_v23  ;;  %v357_v41 = vld [vmem:[#allocation8 + $0x48] sm:$0xff]  ;;  %v84_v44 = vld [vmem:[#allocation2 + $0x38] sm:$0xff]  ;;  %v764_v46 = vpack.c.bf16 %v238_v43, %v237_v42  ;;  %v358_v47 = vld [vmem:[#allocation8 + $0x50] sm:$0xff] }
  0x56   :  { %639 = vmatprep.mubr.msk.f32.mxu0 %vm89_vm0, %v79_v21  ;;  %779 = vmatpush3.bf16.msra.mxu0 %v776_v14  ;;  %v792_v45 = vpack.c.bf16 %v357_v41, %v356_v40  ;;  %v359_v48 = vld [vmem:[#allocation8 + $0x58] sm:$0xff]  ;;  %v239_v49 = vld [vmem:[#allocation7 + $0x60] sm:$0xff]  ;;  %v240_v50 = vld [vmem:[#allocation7 + $0x68] sm:$0xff] }
  0x57   :  { %781 = vmatprep.subr.bf16.mxu0 %v780_v22  ;;  %v796_v51 = vpack.c.bf16 %v359_v48, %v358_v47  ;;  %v768_v52 = vpack.c.bf16 %v240_v50, %v239_v49  ;;  %v360_v53 = vld [vmem:[#allocation8 + $0x60] sm:$0xff]  ;;  %v361_v54 = vld [vmem:[#allocation8 + $0x68] sm:$0xff]  ;;  %v241_v55 = vld [vmem:[#allocation7 + $0x70] sm:$0xff] }
  0x58   :  { %755 = vmatpush3.bf16.msra.mxu1 %v752_v23  ;;  %v242_v56 = vld [vmem:[#allocation7 + $0x78] sm:$0xff]  ;;  %v800_v57 = vpack.c.bf16 %v361_v54, %v360_v53  ;;  %v362_v59 = vld [vmem:[#allocation8 + $0x70] sm:$0xff] }
  0x59   :  { %640 = vmatmul.mubr.msk.f32.gmra.mrb[2].mxu0 %vm89_vm0, %v80_v28  ;;  %757 = vmatprep.subr.bf16.mxu1 %v756_v31  ;;  %v772_v58 = vpack.c.bf16 %v242_v56, %v241_v55  ;;  %v363_v60 = vld [vmem:[#allocation8 + $0x78] sm:$0xff] }
  0x5a   :  { %642 = vmatprep.mubr.msk.f32.mxu0 %vm89_vm0, %v81_v29  ;;  %783 = vmatpush3.bf16.msra.mxu0 %v780_v22  ;;  %v804_v61 = vpack.c.bf16 %v363_v60, %v362_v59 }
  0x5b   :  { %785 = vmatprep.subr.bf16.mxu0 %v784_v30 }
  0x5c   :  { %759 = vmatpush3.bf16.msra.mxu1 %v756_v31 }
  0x5d   :  { %643 = vmatmul.mubr.msk.f32.gmra.mrb[4].mxu0 %vm89_vm0, %v82_v36  ;;  %761 = vmatprep.subr.bf16.mxu1 %v760_v39 }
  0x5e   :  { %645 = vmatprep.mubr.msk.f32.mxu0 %vm89_vm0, %v83_v37  ;;  %787 = vmatpush3.bf16.msra.mxu0 %v784_v30 }
  0x5f   :  { %789 = vmatprep.subr.bf16.mxu0 %v788_v38 }
  0x60   :  { %763 = vmatpush3.bf16.msra.mxu1 %v760_v39 }
  0x61   :  { %646 = vmatmul.mubr.msk.f32.gmra.mrb[6].mxu0 %vm89_vm0, %v84_v44  ;;  %765 = vmatprep.subr.bf16.mxu1 %v764_v46 }
  0x62   :  { %791 = vmatpush3.bf16.msra.mxu0 %v788_v38 }
  0x63   :  { %793 = vmatprep.subr.bf16.mxu0 %v792_v45 }
  0x64   :  { %767 = vmatpush3.bf16.msra.mxu1 %v764_v46 }
  0x65   :  { %769 = vmatprep.subr.bf16.mxu1 %v768_v52 }
  0x66   :  { %795 = vmatpush3.bf16.msra.mxu0 %v792_v45 }
  0x67   :  { %797 = vmatprep.subr.bf16.mxu0 %v796_v51 }
  0x68   :  { %771 = vmatpush3.bf16.msra.mxu1 %v768_v52 }
  0x69   :  { %773 = vmatprep.subr.bf16.mxu1 %v772_v58 }
  0x6a   :  { %799 = vmatpush3.bf16.msra.mxu0 %v796_v51 }
  0x6b   :  { %801 = vmatprep.subr.bf16.mxu0 %v800_v57 }
  0x6c   :  { %775 = vmatpush3.bf16.msra.mxu1 %v772_v58 }
  0x6e   :  { %803 = vmatpush3.bf16.msra.mxu0 %v800_v57 }
  0x6f   :  { %805 = vmatprep.subr.bf16.mxu0 %v804_v61 }
  0x72   :  { %807 = vmatpush3.bf16.msra.mxu0 %v804_v61 }
 0x128   :  { %v638_v62 = vpop.f32.mrb[0].mxu0 }
 0x129   :  { %220 = vst [vmem:[#allocation10 + $0x8] sm:$0xff] %v638_v62  ;;  %v180_v63 = vpop.f32.mrb[1].mxu0 }
 0x12a   :  { %219 = vst [vmem:[#allocation10] sm:$0xff] %v180_v63  ;;  %680 = vmatprep.mubr.f32.mxu1 %v180_v63  ;;  %724 = vmatprep.mubr.f32.mxu0 %v180_v63 }
 0x12b   :  { %681 = vmatmul.mubr.f32.vlgmr.msra.gmra.mrb[0].mxu1 %v638_v62  ;;  %725 = vmatmul.mubr.f32.vlgmr.msra.gmra.mrb[8].mxu0 %v638_v62 }
 0x12c   :  { %v641_v0 = vpop.f32.mrb[2].mxu0 }
 0x12d   :  { %222 = vst [vmem:[#allocation10 + $0x18] sm:$0xff] %v641_v0  ;;  %v190_v1 = vpop.f32.mrb[3].mxu0 }
 0x12e   :  { %221 = vst [vmem:[#allocation10 + $0x10] sm:$0xff] %v190_v1  ;;  %683 = vmatprep.mubr.f32.mxu1 %v190_v1  ;;  %727 = vmatprep.mubr.f32.mxu0 %v190_v1 }
 0x12f   :  { %684 = vmatmul.mubr.f32.gmra.mrb[2].mxu1 %v641_v0  ;;  %728 = vmatmul.mubr.f32.gmra.mrb[10].mxu0 %v641_v0 }
 0x130   :  { %v644_v2 = vpop.f32.mrb[4].mxu0 }
 0x131   :  { %224 = vst [vmem:[#allocation10 + $0x28] sm:$0xff] %v644_v2  ;;  %v200_v3 = vpop.f32.mrb[5].mxu0 }
 0x132   :  { %223 = vst [vmem:[#allocation10 + $0x20] sm:$0xff] %v200_v3  ;;  %686 = vmatprep.mubr.f32.mxu1 %v200_v3  ;;  %730 = vmatprep.mubr.f32.mxu0 %v200_v3 }
 0x133   :  { %687 = vmatmul.mubr.f32.gmra.mrb[4].mxu1 %v644_v2  ;;  %731 = vmatmul.mubr.f32.gmra.mrb[12].mxu0 %v644_v2 }
 0x134   :  { %v647_v4 = vpop.f32.mrb[6].mxu0 }
 0x135   :  { %226 = vst [vmem:[#allocation10 + $0x38] sm:$0xff] %v647_v4  ;;  %v210_v5 = vpop.f32.mrb[7].mxu0 }
 0x136   :  { %225 = vst [vmem:[#allocation10 + $0x30] sm:$0xff] %v210_v5  ;;  %689 = vmatprep.mubr.f32.mxu1 %v210_v5  ;;  %733 = vmatprep.mubr.f32.mxu0 %v210_v5 }
 0x137   :  { %690 = vmatmul.mubr.f32.gmra.mrb[6].mxu1 %v647_v4  ;;  %734 = vmatmul.mubr.f32.gmra.mrb[14].mxu0 %v647_v4 }
 0x1fe   :  { %v682_v6 = vpop.f32.mrb[0].mxu1  ;;  %v726_v7 = vpop.f32.mrb[8].mxu0 }
 0x1ff   :  { %471 = vst.msk [vmem:[#allocation13 + $0x8] sm:$0xff] %vm469_vm1, %v726_v7  ;;  %v309_v8 = vpop.f32.mrb[1].mxu1  ;;  %v430_v9 = vpop.f32.mrb[9].mxu0 }
 0x200   :  { %470 = vst.msk [vmem:[#allocation13] sm:$0xff] %vm469_vm1, %v430_v9  ;;  %478 = vxpose.xlu0.b32.start [1/8] (short) (narrow) %v309_v8, 8 }
 0x202   :  { %v685_v10 = vpop.f32.mrb[2].mxu1  ;;  %v729_v11 = vpop.f32.mrb[10].mxu0 }
 0x203   :  { %473 = vst.msk [vmem:[#allocation13 + $0x18] sm:$0xff] %vm469_vm1, %v729_v11  ;;  %v319_v12 = vpop.f32.mrb[3].mxu1  ;;  %v440_v13 = vpop.f32.mrb[11].mxu0 }
 0x204   :  { %917 = shalt.err (!%p914_p8)
}
 0x205   :  { %s918_s26 = scalar_lea.hbm %s1169_s4, 1024 }
 0x206   :  { %p919_p9 = scmp.ne.s32.totalorder %s1169_s4, %s918_s26  ;;  %p922_p10 = scmp.lt.u32.totalorder %s918_s26, %s1169_s4 }
 0x208   :  { %p924_p11 = pnand %p922_p10, %p919_p9 }
 0x20a   :  { %927 = shalt.err (!%p924_p11)
}
 0x20b   :  { %523 = dma.vmem_to_hbm [thread:$0]  %s518_s21, 1024, %s1169_s4, [#allocation4], %s984_s9, %s984_s9, %s985_s10   ;;  %479 = vxpose.xlu0.b32.cont [2/8] (short) (narrow) %v682_v6, 8  ;;  %472 = vst.msk [vmem:[#allocation13 + $0x10] sm:$0xff] %vm469_vm1, %v440_v13  ;;  %v688_v14 = vpop.f32.mrb[4].mxu1  ;;  %v732_v15 = vpop.f32.mrb[12].mxu0 }
 0x20c   :  { %475 = vst.msk [vmem:[#allocation13 + $0x28] sm:$0xff] %vm469_vm1, %v732_v15  ;;  %v329_v16 = vpop.f32.mrb[5].mxu1  ;;  %v450_v17 = vpop.f32.mrb[13].mxu0  ;;  %s989_s4 = smov [#allocation11]   ;;  %s990_s0 = smov [#allocation13]   ;;  %vm510_vm2 = vcmask 523264  }
 0x20d   :  { %474 = vst.msk [vmem:[#allocation13 + $0x20] sm:$0xff] %vm469_vm1, %v450_v17  ;;  %v691_v18 = vpop.f32.mrb[6].mxu1  ;;  %v735_v19 = vpop.f32.mrb[14].mxu0  ;;  %s530_s11 = sshll.u32 %s989_s4, 4  ;;  %s539_s24 = sshll.u32 %s990_s0, 4  ;;  %s531_s11 = int_to_ptr.vmem [resolvable:$true] %s530_s11  ;;  %s1131_s24 = int_to_ptr.vmem [resolvable:$true] %s539_s24 }
 0x20e   :  { %477 = vst.msk [vmem:[#allocation13 + $0x38] sm:$0xff] %vm469_vm1, %v735_v19  ;;  %v339_v20 = vpop.f32.mrb[7].mxu1  ;;  %v460_v21 = vpop.f32.mrb[15].mxu0  ;;  %s928_s12 = scalar_lea.vmem %s531_s11, 128  ;;  %p933_p13 = scmp.lt.s32.totalorder %s531_s11, %s531_s11 }
 0x20f   :  { %480 = vxpose.xlu0.b32.cont [3/8] (short) (narrow) %v319_v12, 8  ;;  %476 = vst.msk [vmem:[#allocation13 + $0x30] sm:$0xff] %vm469_vm1, %v460_v21  ;;  %p929_p12 = scmp.ne.s32.totalorder %s531_s11, %s928_s12  ;;  %p934_p0 = scmp.lt.s32.totalorder %s928_s12, %s928_s12 }
 0x211   :  { %p935_p1 = por %p934_p0, %p933_p13 }
 0x213   :  { %481 = vxpose.xlu0.b32.cont [4/8] (short) (narrow) %v685_v10, 8  ;;  %p936_p2 = pnand %p935_p1, %p929_p12 }
 0x217   :  { %482 = vxpose.xlu0.b32.cont [5/8] (short) (narrow) %v329_v16, 8 }
 0x21b   :  { %483 = vxpose.xlu0.b32.cont [6/8] (short) (narrow) %v688_v14, 8 }
 0x21f   :  { %484 = vxpose.xlu0.b32.cont [7/8] (short) (narrow) %v339_v20, 8 }
 0x223   :  { %485 = vxpose.xlu0.b32.end [8/8] (short) (narrow) %v691_v18, 8 }
 0x287   :  { %v494_v22 = vpop.trf.xlu0 }
 0x288   :  { %511 = vst.msk [vmem:[#allocation11] sm:$0xff] %vm510_vm2, %v494_v22 }
 0x289   :  { %939 = shalt.err (!%p936_p2)
}
 0x28a   :  { %s940_s15 = scalar_lea.hbm %s1170_s5, 128 }
 0x28b   :  { %p941_p3 = scmp.ne.s32.totalorder %s1170_s5, %s940_s15  ;;  %p944_p4 = scmp.lt.u32.totalorder %s940_s15, %s1170_s5 }
 0x28d   :  { %p946_p5 = pnand %p944_p4, %p941_p3 }
 0x28f   :  { %949 = shalt.err (!%p946_p5)
}
 0x290   :  { %533 = dma.vmem_to_hbm [thread:$0]  %s531_s11, 128, %s1170_s5, [#allocation12]  }
 0x291   :  { %s950_s1 = scalar_lea.vmem %s1131_s24, 1024  ;;  %p955_p7 = scmp.lt.s32.totalorder %s1131_s24, %s1131_s24 }
 0x292   :  { %p951_p6 = scmp.ne.s32.totalorder %s1131_s24, %s950_s1  ;;  %p956_p8 = scmp.lt.s32.totalorder %s950_s1, %s950_s1 }
 0x294   :  { %p957_p9 = por %p956_p8, %p955_p7 }
 0x296   :  { %p958_p10 = pnand %p957_p9, %p951_p6 }
 0x298   :  { %961 = shalt.err (!%p958_p10)
}
 0x299   :  { %s962_s22 = scalar_lea.hbm %s1171_s6, 1024 }
 0x29a   :  { %p963_p11 = scmp.ne.s32.totalorder %s1171_s6, %s962_s22  ;;  %p966_p12 = scmp.lt.u32.totalorder %s962_s22, %s1171_s6 }
 0x29c   :  { %p968_p13 = pnand %p966_p12, %p963_p11 }
 0x29e   :  { %971 = shalt.err (!%p968_p13)
}
 0x29f   :  { %545 = dma.vmem_to_hbm [thread:$0]  %s1131_s24, 1024, %s1171_s6, [#allocation12], %s984_s9, %s984_s9, %s985_s10  }
 0x2a0   :  { %978 = dma.done.wait [#allocation4], 1024  }
 0x2a1   :  { %979 = vsyncadd [#allocation4], 4294966272 }
 0x2a2   :  { %980 = dma.done.wait [#allocation12], 1152  }
 0x2a3   :  { %981 = vsyncadd [#allocation12], 4294966144 }
 0x2a4   :  { %555 = vsyncpa [#allocation3], 1 }
 0x2a5   :  { %556 = vsyncpa [#allocation6], 1 }
 0x2a6   :  { %557 = vsyncpa [#allocation9], 1 }
 0x2a7   :  { %558 = vsyncpa [#allocation4], 1 }
 0x2a8   :  { %559 = vsyncpa [#allocation12], 1 }

</bundles_post_ra>
